<compile_context>
chip_gen: v7x
topology: tpu7x:2x2x1
jax: 0.10.0
libtpu: 0.0.40
codegen_flags: <defaults>
</compile_context>

<pallas_src>
import jax
import jax.numpy as jnp
from jax.experimental import pallas as pl
from jax.experimental.pallas import tpu as pltpu


def _make_kernel(*, fused, has_bias, batched):
    """Builds the kernel body for the chosen (fused, bias, batching) variant."""

    def kernel(*refs):
        x_ref = refs[0]
        o_ref = refs[-1]
        if fused:
            w = refs[1][...]                      # (O, C)
        else:
            l = refs[1][...]                      # (R, C)
            r = refs[2][...]                      # (O, R)
        b = refs[-2][...] if has_bias else None   # (O, 1), f32

        def apply(x):                             # x: (C, M) -> (O, M)
            if fused:
                y = jnp.dot(w, x, preferred_element_type=jnp.float32)
            else:
                h = jnp.dot(l, x, preferred_element_type=jnp.float32)
                y = jnp.dot(r, h, preferred_element_type=jnp.float32)
            if b is not None:
                y = y + b
            return y.astype(o_ref.dtype)

        if batched:
            # x_ref: (BN, C, HW), o_ref: (BN, O, HW); BN is small & static.
            for i in range(x_ref.shape[0]):
                o_ref[i] = apply(x_ref[i])
        else:
            # x_ref: (C, TM), o_ref: (O, TM)
            o_ref[...] = apply(x_ref[...])

    return kernel


def _vmem_capacity_bytes():
    try:
        info = pltpu.get_tpu_info()
        cap = getattr(info, "vmem_capacity_bytes", None)
        if cap:
            return int(cap)
    except Exception:
        pass
    return 128 * 1024 * 1024


def svdconv2d_m(x_nchw, left_factor, right_factor, bias=None, *, target_tm=2048):
    """1x1 SVD conv. x_nchw: (N, C, H, W). Returns (N, O, H, W)."""
    N, C, H, W = x_nchw.shape
    R, C2 = left_factor.shape
    O, R2 = right_factor.shape
    assert C == C2 and R == R2

    HW = H * W
    dtype = x_nchw.dtype
    itemsize = jnp.dtype(dtype).itemsize
    has_bias = bias is not None

    # NCHW -> (N, C, H*W): contiguous reshape, no transpose, no extra HBM pass.
    x3 = x_nchw.reshape(N, C, HW)

    # ---- generation-aware VMEM budgets (v7x: 64 MiB, v5e/v6e: 128 MiB) ------
    vmem_cap = _vmem_capacity_bytes()
    small_vmem = vmem_cap <= (64 << 20)                   # v7x
    tile_budget = (12 << 20) if small_vmem else (24 << 20)
    vmem_clamp_hi = (32 << 20) if small_vmem else (48 << 20)

    # ---- MXU-tile-aware fusion decision --------------------------------------
    T = 128  # conservative MXU tile width across v5e/v6e/v7x
    fuse = (pl.cdiv(O, T) * pl.cdiv(C, T)
            <= pl.cdiv(R, T) * (pl.cdiv(C, T) + pl.cdiv(O, T)))

    if fuse:
        # Fuse in f32 for accuracy, then cast to the activation dtype so the
        # MXU runs its native path (bf16 end-to-end if the caller uses bf16).
        w = jnp.dot(right_factor.astype(jnp.float32),
                    left_factor.astype(jnp.float32)).astype(dtype)
        weight_bytes = O * C * itemsize
    else:
        lf = left_factor.astype(dtype)
        rf = right_factor.astype(dtype)
        weight_bytes = (R * C + O * R) * itemsize

    if has_bias:
        bias2d = bias.reshape(O, 1).astype(jnp.float32)

    # ---- tiling ---------------------------------------------------------------
    if HW <= target_tm:
        # Small feature map: block several batch samples per grid step to
        # amortise per-step overhead and the weight broadcast.
        batched = True
        MAX_UNROLL = 32
        bn_fit = max(1, target_tm // HW)
        bn_budget = max(1, tile_budget // (2 * (C + O) * HW * itemsize))
        BN = max(1, min(N, bn_fit, bn_budget, MAX_UNROLL))
        if small_vmem and N >= 2 and pl.cdiv(N, BN) < 2:
            BN = pl.cdiv(N, 2)      # keep >=2 grid steps so both v7x TCs work
        # Ragged last batch block (N % BN != 0): OOB reads padded, writes masked.
        grid = (pl.cdiv(N, BN),)
        x_spec = pl.BlockSpec((BN, C, HW), lambda n: (n, 0, 0))
        o_spec = pl.BlockSpec((BN, O, HW), lambda n: (n, 0, 0))
        const_map = lambda n: (0, 0)
        dims = ("parallel",)
        tile_bytes = 2 * BN * (C + O) * HW * itemsize
    else:
        batched = False
        tm = max(128, (target_tm // 128) * 128)
        max_tm = tile_budget // (2 * (C + O) * itemsize)
        tm = min(tm, max(128, (max_tm // 128) * 128))
        # No HBM padding: the ragged last pixel tile is handled by Pallas OOB
        # block semantics (reads padded, writes masked) -- safe because the op
        # is pointwise along the pixel axis.
        grid = (N, pl.cdiv(HW, tm))
        x_spec = pl.BlockSpec((None, C, tm), lambda n, j: (n, 0, j))
        o_spec = pl.BlockSpec((None, O, tm), lambda n, j: (n, 0, j))
        const_map = lambda n, j: (0, 0)
        dims = ("parallel", "parallel")
        tile_bytes = 2 * (C + O) * tm * itemsize

    # ---- VMEM limit / cost hint ----------------------------------------------
    vmem_bytes = tile_bytes + 2 * weight_bytes + (8 * O if has_bias else 0) + (4 << 20)
    vmem_bytes = int(min(max(vmem_bytes, 16 << 20), vmem_clamp_hi))

    M = N * HW
    flops = 2 * M * (C * O if fuse else (C * R + R * O))
    bytes_accessed = itemsize * M * (C + O) + weight_bytes + (4 * O if has_bias else 0)
    cost = pl.CostEstimate(flops=int(flops), transcendentals=0,
                           bytes_accessed=int(bytes_accessed))

    cparams = pltpu.CompilerParams(dimension_semantics=dims,
                                   vmem_limit_bytes=vmem_bytes)

    kernel = _make_kernel(fused=fuse, has_bias=has_bias, batched=batched)

    in_specs = [x_spec]
    operands = [x3]
    if fuse:
        in_specs.append(pl.BlockSpec((O, C), const_map))
        operands.append(w)
    else:
        in_specs.append(pl.BlockSpec((R, C), const_map))
        in_specs.append(pl.BlockSpec((O, R), const_map))
        operands.extend([lf, rf])
    if has_bias:
        in_specs.append(pl.BlockSpec((O, 1), const_map))
        operands.append(bias2d)

    out = pl.pallas_call(
        kernel,
        out_shape=jax.ShapeDtypeStruct((N, O, HW), dtype),
        grid_spec=pltpu.PrefetchScalarGridSpec(
            num_scalar_prefetch=0,
            grid=grid,
            in_specs=in_specs,
            out_specs=o_spec),
        compiler_params=cparams,
        cost_estimate=cost,
    )(*operands)

    return out.reshape(N, O, H, W)   # already NCHW: free reshape, no transpose


# ----------------------------- test helpers ----------------------------------

def _xavier_uniform(key, shape, dtype=jnp.float32):
    fan_out, fan_in = shape  # matches torch.nn.init.xavier_uniform_ for 2D
    limit = (6.0 / (fan_in + fan_out)) ** 0.5
    return jax.random.uniform(key, shape, dtype, minval=-limit, maxval=limit)


def _reference(x, left_factor, right_factor, bias):
    y = jnp.einsum("rc,nchw->nrhw", left_factor, x)
    y = jnp.einsum("or,nrhw->nohw", right_factor, y)
    if bias is not None:
        y = y + bias[None, :, None, None]
    return y


def _check(out, ref, atol=1e-4, rtol=1e-4):
    assert out.shape == ref.shape, (out.shape, ref.shape)
    assert jnp.allclose(out, ref, atol=atol, rtol=rtol), float(
        jnp.max(jnp.abs(out - ref)))


if __name__ == "__main__":
    key = jax.random.PRNGKey(0)

    # --- case 1: module example shapes (fused, small-HW batched path, bias) ---
    k = jax.random.split(key, 5)
    key = k[0]
    x = jax.random.normal(k[1], (2, 4, 16, 16), jnp.float32)
    lf = _xavier_uniform(k[2], (3, 4))          # (rank, in_channels)
    rf = _xavier_uniform(k[3], (8, 3))          # (out_channels, rank)
    b = 0.1 * jax.random.normal(k[4], (8,), jnp.float32)
    out = svdconv2d_m(x, lf, rf, b)
    jax.block_until_ready(out)
    _check(out, _reference(x, lf, rf, b))

    # --- case 2: wider channels, still fused per MXU-tile heuristic -----------
    k = jax.random.split(key, 5)
    key = k[0]
    x2 = jax.random.normal(k[1], (2, 32, 16, 16), jnp.float32)
    lf2 = _xavier_uniform(k[2], (3, 32))
    rf2 = _xavier_uniform(k[3], (32, 3))
    b2 = 0.1 * jax.random.normal(k[4], (32,), jnp.float32)
    out2 = svdconv2d_m(x2, lf2, rf2, b2)
    jax.block_until_ready(out2)
    _check(out2, _reference(x2, lf2, rf2, b2))

    # --- case 3: HW > target_tm -> tiled pixel axis with a ragged last tile ---
    k = jax.random.split(key, 5)
    key = k[0]
    x3 = jax.random.normal(k[1], (1, 8, 48, 48), jnp.float32)   # HW=2304 > 2048
    lf3 = _xavier_uniform(k[2], (2, 8))
    rf3 = _xavier_uniform(k[3], (16, 2))
    b3 = 0.1 * jax.random.normal(k[4], (16,), jnp.float32)
    out3 = svdconv2d_m(x3, lf3, rf3, b3)
    jax.block_until_ready(out3)
    _check(out3, _reference(x3, lf3, rf3, b3))

    # --- case 4: large channel counts -> low-rank two-matmul path, no bias ----
    k = jax.random.split(key, 4)
    key = k[0]
    x4 = jax.random.normal(k[1], (2, 256, 8, 8), jnp.float32)
    lf4 = _xavier_uniform(k[2], (4, 256))
    rf4 = _xavier_uniform(k[3], (384, 4))
    out4 = svdconv2d_m(x4, lf4, rf4, None)
    jax.block_until_ready(out4)
    _check(out4, _reference(x4, lf4, rf4, None))

    print("KERNEL_OK")
</pallas_src>

<mosaic_0001>
module attributes {stable_mosaic.version = 11 : i64} {
  func.func @kernel(%arg0: i32, %arg1: memref<2x4x256xf32, #tpu.memory_space<vmem>>, %arg2: memref<8x4xf32, #tpu.memory_space<vmem>>, %arg3: memref<8x1xf32, #tpu.memory_space<vmem>>, %arg4: memref<2x8x256xf32, #tpu.memory_space<vmem>>) attributes {dimension_semantics = [#tpu.dimension_semantics<parallel>], iteration_bounds = array<i64: 1>, scalar_prefetch = 0 : i64, scratch_operands = 0 : i64, tpu.core_type = #tpu.core_type<tc>, window_params = [{transform_indices = @transform_0, window_bounds = array<i64: 2, 4, 256>}, {pipeline_mode = #tpu.pipeline_mode<synchronous>, transform_indices = @transform_1, window_bounds = array<i64: 8, 4>}, {pipeline_mode = #tpu.pipeline_mode<synchronous>, transform_indices = @transform_2, window_bounds = array<i64: 8, 1>}, {transform_indices = @transform_3, window_bounds = array<i64: 2, 8, 256>}]} {
    %c0 = arith.constant 0 : index
    %c0_0 = arith.constant 0 : index
    %0 = vector.load %arg2[%c0, %c0_0] : memref<8x4xf32, #tpu.memory_space<vmem>>, vector<8x4xf32>
    %c0_1 = arith.constant 0 : index
    %c0_2 = arith.constant 0 : index
    %1 = vector.load %arg3[%c0_1, %c0_2] : memref<8x1xf32, #tpu.memory_space<vmem>>, vector<8x1xf32>
    %c0_3 = arith.constant 0 : index
    %c0_4 = arith.constant 0 : index
    %c0_5 = arith.constant 0 : index
    %2 = vector.load %arg1[%c0_3, %c0_4, %c0_5] : memref<2x4x256xf32, #tpu.memory_space<vmem>>, vector<1x4x256xf32>
    %3 = vector.shape_cast %2 : vector<1x4x256xf32> to vector<4x256xf32>
    %cst = arith.constant dense<0.000000e+00> : vector<8x256xf32>
    %4 = tpu.matmul %0, %3, %cst {dimension_numbers = #tpu.dot_dimension_numbers<[1], [0], [0], [1], [0, 0, 1, 1], [], []>} : vector<8x4xf32>, vector<4x256xf32>, vector<8x256xf32> -> vector<8x256xf32>
    %5 = vector.broadcast %1 : vector<8x1xf32> to vector<8x256xf32>
    %6 = arith.addf %4, %5 : vector<8x256xf32>
    %c0_6 = arith.constant 0 : index
    %c0_7 = arith.constant 0 : index
    %c0_8 = arith.constant 0 : index
    %7 = vector.load %arg4[%c0_6, %c0_7, %c0_8] : memref<2x8x256xf32, #tpu.memory_space<vmem>>, vector<1x8x256xf32>
    %8 = vector.shape_cast %7 : vector<1x8x256xf32> to vector<8x256xf32>
    %9 = vector.shape_cast %6 : vector<8x256xf32> to vector<1x8x256xf32>
    tpu.vector_store %arg4[%c0_6, %c0_7, %c0_8], %9 {strides = array<i32>} : memref<2x8x256xf32, #tpu.memory_space<vmem>>, vector<1x8x256xf32>,
    %c1 = arith.constant 1 : index
    %c0_9 = arith.constant 0 : index
    %c0_10 = arith.constant 0 : index
    %10 = vector.load %arg1[%c1, %c0_9, %c0_10] : memref<2x4x256xf32, #tpu.memory_space<vmem>>, vector<1x4x256xf32>
    %11 = vector.shape_cast %10 : vector<1x4x256xf32> to vector<4x256xf32>
    %cst_11 = arith.constant dense<0.000000e+00> : vector<8x256xf32>
    %12 = tpu.matmul %0, %11, %cst_11 {dimension_numbers = #tpu.dot_dimension_numbers<[1], [0], [0], [1], [0, 0, 1, 1], [], []>} : vector<8x4xf32>, vector<4x256xf32>, vector<8x256xf32> -> vector<8x256xf32>
    %13 = vector.broadcast %1 : vector<8x1xf32> to vector<8x256xf32>
    %14 = arith.addf %12, %13 : vector<8x256xf32>
    %c1_12 = arith.constant 1 : index
    %c0_13 = arith.constant 0 : index
    %c0_14 = arith.constant 0 : index
    %15 = vector.load %arg4[%c1_12, %c0_13, %c0_14] : memref<2x8x256xf32, #tpu.memory_space<vmem>>, vector<1x8x256xf32>
    %16 = vector.shape_cast %15 : vector<1x8x256xf32> to vector<8x256xf32>
    %17 = vector.shape_cast %14 : vector<8x256xf32> to vector<1x8x256xf32>
    tpu.vector_store %arg4[%c1_12, %c0_13, %c0_14], %17 {strides = array<i32>} : memref<2x8x256xf32, #tpu.memory_space<vmem>>, vector<1x8x256xf32>,
    return
  }
  func.func @transform_0(%arg0: i32) -> (i32, i32, i32) {
    %c0_i32 = arith.constant 0 : i32
    %c0_i32_0 = arith.constant 0 : i32
    %c0_i32_1 = arith.constant 0 : i32
    return %arg0, %c0_i32, %c0_i32_0 : i32, i32, i32
  }
  func.func @transform_1(%arg0: i32) -> (i32, i32) {
    %c0_i32 = arith.constant 0 : i32
    %c0_i32_0 = arith.constant 0 : i32
    %c0_i32_1 = arith.constant 0 : i32
    return %c0_i32, %c0_i32_0 : i32, i32
  }
  func.func @transform_2(%arg0: i32) -> (i32, i32) {
    %c0_i32 = arith.constant 0 : i32
    %c0_i32_0 = arith.constant 0 : i32
    %c0_i32_1 = arith.constant 0 : i32
    return %c0_i32, %c0_i32_0 : i32, i32
  }
  func.func @transform_3(%arg0: i32) -> (i32, i32, i32) {
    %c0_i32 = arith.constant 0 : i32
    %c0_i32_0 = arith.constant 0 : i32
    %c0_i32_1 = arith.constant 0 : i32
    return %arg0, %c0_i32, %c0_i32_0 : i32, i32, i32
  }
}

</mosaic_0001>

<bundles_post_ra>
// kernel: tpu_custom_call.1
= control target key start
LH: loop header
LB: loop body
LE: loop exit
PB: predicated region body
PF: predicated region fallthrough
CT: control target
= control target key end

     0   :  { %vm29_vm0 = vcmask 1043456   ;;  %v244_v4 = vmov 0.0   ;;  %s297_s0 = inlined_call_operand.vmem [shape: f32[2,4,256], index: 0, kind: input, shape index: {}]   ;;  %s298_s1 = inlined_call_operand.vmem [shape: f32[8,4], index: 1, kind: input, shape index: {}]   ;;  %s299_s2 = inlined_call_operand.vmem [shape: f32[8,1], index: 2, kind: input, shape index: {}]   ;;  %s300_s3 = inlined_call_operand.hbm [shape: f32[2,8,256], index: 3, kind: output, shape index: {}]  }
   0x1   :  { %v17_v0 = vld [vmem:[%s297_s0] sm:$0xff]  ;;  %v208_v1 = vld [vmem:[%s297_s0 + $0x8] sm:$0xff]  ;;  %98 = vmatprep.mubr.f32.mxu0 %v244_v4  ;;  %179 = vmatprep.mubr.f32.mxu1 %v244_v4 }
   0x2   :  { %v24_v2 = vcombine.high %v17_v0, %v17_v0  ;;  %v110_v3 = vcombine.high %v208_v1, %v208_v1 }
   0x3   :  { %8 = vsyncpa [#allocation3], 0  ;;  %v15_v5 = vld [vmem:[%s298_s1] sm:$0xff]  ;;  %vm25_vm1 = vcmask 31744   ;;  %v245_v6 = vmov 0   ;;  %s246_s0 = smov [#allocation2]  }
   0x4   :  { %217 = vset.pattern.permute.xlu0 %v245_v6  ;;  %205 = vmatprep.subr.msk.mxu0 %vm29_vm0, %v24_v2  ;;  %v16_v7 = vld [vmem:[%s299_s2] sm:$0xff]  ;;  %s194_s1 = sshll.u32 %s246_s0, 4  ;;  %s195_s1 = int_to_ptr.vmem [resolvable:$true] %s194_s1 }
   0x5   :  { %209 = vmatprep.subr.msk.mxu1 %vm29_vm0, %v110_v3  ;;  %206 = vmatpush1.msk.msra.mxu0 %vm29_vm0, %v17_v0  ;;  %s220_s2 = scalar_lea.vmem %s195_s1, 512  ;;  %p225_p1 = scmp.lt.s32.totalorder %s195_s1, %s195_s1 }
   0x6   :  { %210 = vmatpush1.msk.msra.mxu1 %vm29_vm0, %v208_v1  ;;  %207 = vmatmul.mubr.msk.f32.vlgmr.msra.gmra.mrb[0].mxu0 %vm25_vm1, %v15_v5  ;;  %p221_p0 = scmp.ne.s32.totalorder %s195_s1, %s220_s2  ;;  %p226_p2 = scmp.lt.s32.totalorder %s220_s2, %s220_s2 }
   0x7   :  { %211 = vmatmul.mubr.msk.f32.vlgmr.msra.gmra.mrb[0].mxu1 %vm25_vm1, %v15_v5  ;;  %20 = vperm.xlu0 %217, %v16_v7  }
   0x8   :  { %p227_p3 = por %p226_p2, %p225_p1 }
   0xa   :  { %p228_p4 = pnand %p227_p3, %p221_p0 }
  0x86   :  { %v21_v8 = vpop.permute.xlu0 %20 }
  0xd9   :  { %v100_v9 = vpop.f32.mrb[0].mxu0 }
  0xda   :  { %v181_v10 = vpop.f32.mrb[0].mxu1  ;;  %v101_v11 = vadd.f32 %v100_v9, %v21_v8  ;;  %v102_v13 = vpop.f32.mrb[1].mxu0 }
  0xdb   :  { %v182_v12 = vadd.f32 %v181_v10, %v21_v8  ;;  %v183_v14 = vpop.f32.mrb[1].mxu1  ;;  %v103_v15 = vadd.f32 %v102_v13, %v21_v8 }
  0xdc   :  { %v184_v16 = vadd.f32 %v183_v14, %v21_v8  ;;  %105 = vst [vmem:[#allocation2] sm:$0xff] %v101_v11 }
  0xdd   :  { %187 = vst [vmem:[#allocation2 + $0x10] sm:$0xff] %v182_v12  ;;  %106 = vst [vmem:[#allocation2 + $0x8] sm:$0xff] %v103_v15 }
  0xde   :  { %188 = vst [vmem:[#allocation2 + $0x18] sm:$0xff] %v184_v16 }
  0xdf   :  { %231 = shalt.err (!%p228_p4)
}
  0xe0   :  { %s232_s22 = scalar_lea.hbm %s300_s3, 512 }
  0xe1   :  { %p233_p5 = scmp.ne.s32.totalorder %s300_s3, %s232_s22  ;;  %p236_p6 = scmp.lt.u32.totalorder %s232_s22, %s300_s3 }
  0xe3   :  { %p238_p7 = pnand %p236_p6, %p233_p5 }
  0xe5   :  { %241 = shalt.err (!%p238_p7)
}
  0xe6   :  { %s247_s27 = smov 256   ;;  %s248_s28 = smov 16  }
  0xe7   :  { %200 = dma.vmem_to_hbm [thread:$0]  %s195_s1, 512, %s300_s3, [#allocation3], %s247_s27, %s247_s27, %s248_s28  }
  0xe8   :  { %242 = dma.done.wait [#allocation3], 512  }
  0xe9   :  { %243 = vsyncadd [#allocation3], 4294966784 }
  0xea   :  { %204 = vsyncpa [#allocation3], 1 }

</bundles_post_ra>
